<compile_context>
chip_gen: v6e
topology: v6e:2x2x1
jax: 0.10.0
libtpu: 0.0.40
codegen_flags: <defaults>
</compile_context>

<pallas_src>
import jax
import jax.numpy as jnp
from jax import lax
from jax.experimental import pallas as pl
from jax.experimental.pallas import tpu as pltpu


# Contract the last (feature) dim of both operands: lhs[m, d] * rhs[n, d] -> out[m, n]
_CONTRACT_LAST = (((1,), (1,)), ((), ()))

_LANE = 128
_MAX_TILE = 1024        # max square output tile (multiple of 128)
_MAX_BLOCK_K = 512      # max reduction chunk for the K-tiled path
_K_TILING_THRESHOLD = 1024  # K-tile only when padded D exceeds this


def _dot_last(lhs, rhs):
    # Transpose-free Gram tile on the MXU (contracts the last dim of both).
    return lax.dot_general(
        lhs, rhs, dimension_numbers=_CONTRACT_LAST,
        preferred_element_type=jnp.float32,
    )


def _xxt_kernel(lhs_ref, rhs_ref, o_ref):
    o_ref[...] = _dot_last(lhs_ref[...], rhs_ref[...]).astype(o_ref.dtype)


def _xxt_kernel_k_f32(lhs_ref, rhs_ref, o_ref):
    # f32 output block is resident across the k axis (out index_map ignores k):
    # accumulate in place, no scratch, no final copy.
    @pl.when(pl.program_id(2) == 0)
    def _():
        o_ref[...] = jnp.zeros_like(o_ref)

    o_ref[...] += _dot_last(lhs_ref[...], rhs_ref[...])


def _xxt_kernel_k_acc(lhs_ref, rhs_ref, o_ref, acc_ref):
    # Narrow output dtypes: accumulate in an f32 scratch, downcast on last k.
    @pl.when(pl.program_id(2) == 0)
    def _():
        acc_ref[...] = jnp.zeros_like(acc_ref)

    acc_ref[...] += _dot_last(lhs_ref[...], rhs_ref[...])

    @pl.when(pl.program_id(2) == pl.num_programs(2) - 1)
    def _():
        o_ref[...] = acc_ref[...].astype(o_ref.dtype)


def _round_up(a, b):
    return -(-a // b) * b


def _pick_n_tile(n, max_tile=_MAX_TILE):
    """Square output tile (multiple of 128).

    1) minimize padded N (HBM-write-bound => padded area == wall time),
    2) among those, prefer the largest tile that still yields >= 2 blocks per
       grid axis (>= 4 total) so v7x megacore has work to shard,
    3) otherwise take the largest tile.
    """
    cands = list(range(_LANE, max_tile + 1, _LANE))
    best_pad = min(_round_up(n, t) for t in cands)
    good = [t for t in cands if _round_up(n, t) == best_pad]
    multi = [t for t in good if best_pad // t >= 2]
    tile = max(multi) if multi else max(good)
    return tile, best_pad


def _pick_block_k(d_pad, max_bk=_MAX_BLOCK_K):
    """Largest multiple-of-128 chunk <= max_bk that divides d_pad exactly.

    d_pad is already a multiple of 128, so 128 always qualifies => zero
    K-padding, near-equal chunks.
    """
    best = _LANE
    for bk in range(_LANE, max_bk + 1, _LANE):
        if d_pad % bk == 0:
            best = bk
    return best


def _vmem_limit_bytes(need):
    # Actual tile footprint + headroom, floored at 16 MiB, capped well below
    # v7x's 64 MiB physical VMEM (v5e/v6e have 128 MiB physical).
    return int(min(max(int(need * 1.25) + (2 << 20), 16 << 20), 56 << 20))


def structure_decoder_forward(x, adj=None):
    """Pallas implementation of Structure_Decoder.forward: returns x @ x.T.

    x: (N, D). adj is accepted but unused (exactly as in the reference module).
    """
    N, D = x.shape
    out_dtype = x.dtype
    in_bytes = x.dtype.itemsize
    out_bytes = jnp.zeros((), out_dtype).dtype.itemsize

    # Tiny problems: a pallas_call launch + pipeline setup dwarfs ~N^2*D flops
    # and a sub-128 output lane dim guarantees masked partial stores.
    if N < 128:
        return jnp.dot(x, x.T, preferred_element_type=jnp.float32).astype(out_dtype)

    tile, n_pad = _pick_n_tile(N)
    d_pad128 = _round_up(D, _LANE)
    needs_k_tiling = d_pad128 > _K_TILING_THRESHOLD

    if not needs_k_tiling:
        # Whole feature dim as one block (block last dim == full array dim, so
        # no D padding needed even for D < 128, e.g. D == 32).
        xp = jnp.pad(x, ((0, n_pad - N), (0, 0))) if n_pad != N else x

        need = (2 * 2 * tile * D * in_bytes          # lhs + rhs, double-buffered
                + 2 * tile * tile * out_bytes)       # out, double-buffered
        out = pl.pallas_call(
            _xxt_kernel,
            out_shape=jax.ShapeDtypeStruct((n_pad, n_pad), out_dtype),
            grid_spec=pltpu.PrefetchScalarGridSpec(
                num_scalar_prefetch=0,
                grid=(n_pad // tile, n_pad // tile),
                in_specs=[
                    pl.BlockSpec((tile, D), lambda i, j: (i, 0)),  # lhs rows
                    pl.BlockSpec((tile, D), lambda i, j: (j, 0)),  # rhs rows
                ],
                out_specs=pl.BlockSpec((tile, tile), lambda i, j: (i, j)),
            ),
            compiler_params=pltpu.CompilerParams(
                dimension_semantics=("parallel", "parallel"),
                vmem_limit_bytes=_vmem_limit_bytes(need),
            ),
        )(xp, xp)
    else:
        # Large D: pad D only to lane granularity, split it into equal
        # multiple-of-128 chunks (zero K-padding), accumulate over the k axis.
        d_pad = d_pad128
        block_k = _pick_block_k(d_pad)
        xp = x
        if n_pad != N or d_pad != D:
            xp = jnp.pad(x, ((0, n_pad - N), (0, d_pad - D)))

        f32_out = out_dtype == jnp.float32
        kernel = _xxt_kernel_k_f32 if f32_out else _xxt_kernel_k_acc
        scratch = [] if f32_out else [pltpu.VMEM((tile, tile), jnp.float32)]

        need = (2 * 2 * tile * block_k * in_bytes    # lhs + rhs, double-buffered
                + 2 * tile * tile * out_bytes        # out, double-buffered
                + (0 if f32_out else tile * tile * 4))
        out = pl.pallas_call(
            kernel,
            out_shape=jax.ShapeDtypeStruct((n_pad, n_pad), out_dtype),
            grid_spec=pltpu.PrefetchScalarGridSpec(
                num_scalar_prefetch=0,
                grid=(n_pad // tile, n_pad // tile, d_pad // block_k),
                in_specs=[
                    pl.BlockSpec((tile, block_k), lambda i, j, k: (i, k)),
                    pl.BlockSpec((tile, block_k), lambda i, j, k: (j, k)),
                ],
                out_specs=pl.BlockSpec((tile, tile), lambda i, j, k: (i, j)),
                scratch_shapes=scratch,
            ),
            compiler_params=pltpu.CompilerParams(
                dimension_semantics=("parallel", "parallel", "arbitrary"),
                vmem_limit_bytes=_vmem_limit_bytes(need),
            ),
        )(xp, xp)

    if n_pad != N:
        out = out[:N, :N]
    return out


if __name__ == "__main__":
    key = jax.random.PRNGKey(0)
    kx, ka, kr, kd = jax.random.split(key, 4)

    # Shapes consistent with the module: N nodes, hidden=32, N large enough
    # (>=128) to exercise the tiled Pallas path with lane-dense tiles.
    N, D = 256, 32
    x = jax.random.normal(kx, (N, D), dtype=jnp.float32)
    adj = jax.random.normal(ka, (N, N), dtype=jnp.float32)  # unused, as in ref

    out = jax.block_until_ready(structure_decoder_forward(x, adj))
    ref = x @ x.T
    assert out.shape == (N, N)
    assert jnp.allclose(out, ref, atol=1e-4, rtol=1e-4)

    # Ragged N (not a tile multiple) -> exercises the minimal-pad + slice path.
    Nr = 200
    xr = jax.random.normal(kr, (Nr, D), dtype=jnp.float32)
    out_r = jax.block_until_ready(structure_decoder_forward(xr))
    assert out_r.shape == (Nr, Nr)
    assert jnp.allclose(out_r, xr @ xr.T, atol=1e-4, rtol=1e-4)

    # Large-D path (padded D > 1024) -> exercises the K-tiled, in-place f32
    # accumulation path with zero K-padding (block_k divides padded D exactly).
    Nk, Dk = 256, 1280
    xk = jax.random.normal(kd, (Nk, Dk), dtype=jnp.float32)
    out_k = jax.block_until_ready(structure_decoder_forward(xk))
    assert out_k.shape == (Nk, Nk)
    assert jnp.allclose(out_k, xk @ xk.T, atol=1e-3, rtol=1e-4)

    print("KERNEL_OK")
</pallas_src>

<mosaic_0001>
module attributes {stable_mosaic.version = 11 : i64} {
  func.func @_xxt_kernel(%arg0: i32, %arg1: i32, %arg2: memref<128x32xf32, #tpu.memory_space<vmem>>, %arg3: memref<128x32xf32, #tpu.memory_space<vmem>>, %arg4: memref<128x128xf32, #tpu.memory_space<vmem>>) attributes {dimension_semantics = [#tpu.dimension_semantics<parallel>, #tpu.dimension_semantics<parallel>], iteration_bounds = array<i64: 2, 2>, scalar_prefetch = 0 : i64, scratch_operands = 0 : i64, tpu.core_type = #tpu.core_type<tc>, window_params = [{transform_indices = @transform_0, window_bounds = array<i64: 128, 32>}, {transform_indices = @transform_1, window_bounds = array<i64: 128, 32>}, {transform_indices = @transform_2, window_bounds = array<i64: 128, 128>}]} {
    %c0 = arith.constant 0 : index
    %c0_0 = arith.constant 0 : index
    %0 = vector.load %arg2[%c0, %c0_0] : memref<128x32xf32, #tpu.memory_space<vmem>>, vector<128x32xf32>
    %c0_1 = arith.constant 0 : index
    %c0_2 = arith.constant 0 : index
    %1 = vector.load %arg3[%c0_1, %c0_2] : memref<128x32xf32, #tpu.memory_space<vmem>>, vector<128x32xf32>
    %cst = arith.constant dense<0.000000e+00> : vector<128x128xf32>
    %2 = tpu.matmul %0, %1, %cst {dimension_numbers = #tpu.dot_dimension_numbers<[1], [1], [0], [0], [0, 0, 1, 0], [], []>} : vector<128x32xf32>, vector<128x32xf32>, vector<128x128xf32> -> vector<128x128xf32>
    %c0_3 = arith.constant 0 : index
    %c0_4 = arith.constant 0 : index
    %3 = vector.load %arg4[%c0_3, %c0_4] : memref<128x128xf32, #tpu.memory_space<vmem>>, vector<128x128xf32>
    tpu.vector_store %arg4[%c0_3, %c0_4], %2 {strides = array<i32>} : memref<128x128xf32, #tpu.memory_space<vmem>>, vector<128x128xf32>,
    return
  }
  func.func @transform_0(%arg0: i32, %arg1: i32) -> (i32, i32) {
    %c0_i32 = arith.constant 0 : i32
    %c0_i32_0 = arith.constant 0 : i32
    return %arg0, %c0_i32 : i32, i32
  }
  func.func @transform_1(%arg0: i32, %arg1: i32) -> (i32, i32) {
    %c0_i32 = arith.constant 0 : i32
    %c0_i32_0 = arith.constant 0 : i32
    return %arg1, %c0_i32 : i32, i32
  }
  func.func @transform_2(%arg0: i32, %arg1: i32) -> (i32, i32) {
    %c0_i32 = arith.constant 0 : i32
    return %arg0, %arg1 : i32, i32
  }
}

</mosaic_0001>

<bundles_post_ra>
// kernel: tpu_custom_call.1
= control target key start
LH: loop header
LB: loop body
LE: loop exit
PB: predicated region body
PF: predicated region fallthrough
CT: control target
= control target key end

     0   :  { %7 = vsyncpa [#allocation3], 0  ;;  %s1209_s0 = inlined_call_operand.vmem [shape: f32[256,32], index: 0, kind: input, shape index: {}]   ;;  %s1210_s1 = inlined_call_operand.vmem [shape: f32[256,32], index: 1, kind: input, shape index: {}]   ;;  %s1211_s2 = inlined_call_operand.hbm [shape: f32[256,256], index: 2, kind: output, shape index: {}]  }
   0x1   :  { %9 = vsyncpa [#allocation3 + $0x1], 0  ;;  %s930_s9 = smov 0   ;;  %s932_s10 = smov 0  }
   0x2   :  { %s934_s11 = smov 0   ;;  %s936_s12 = smov 0  }
   0x3   :  { %s938_s13 = smov 0   ;;  %s940_s14 = smov 0  }
   0x4   :  { %s942_s15 = smov 0   ;;  %s944_s16 = smov 0  }
   0x5 LB: > { %s574_s17 = sadd.s32 4294967295, %s909_s16   ;;  %s575_s18 = sadd.s32 4294967294, %s909_s16   ;;  %s909_s16 = sphi %s944_s16, %s15_s16   ;;  %s905_s15 = sphi %s942_s15, %s1220_s15   ;;  %s901_s14 = sphi %s940_s14, %s1219_s14   ;;  %s897_s13 = sphi %s938_s13, %s1218_s13   ;;  %s893_s12 = sphi %s936_s12, %s1217_s12   ;;  %s889_s11 = sphi %s934_s11, %s1216_s11   ;;  %s885_s10 = sphi %s932_s10, %s1215_s10   ;;  %s881_s9 = sphi %s930_s9, %s1214_s9  }
   0x6   : > { %s24_s19 = sadd.s32 1, %s901_s14  ;;  %s27_s20 = sadd.s32 1, %s905_s15 }
   0x7   : > { %p25_p0 = scmp.ge.s32.totalorder %s24_s19, 2  ;;  %p98_p1 = scmp.ne.s32.totalorder %s889_s11, %s885_s10 }
   0x8   : > { %p99_p2 = scmp.eq.s32.totalorder %s574_s17, 3  ;;  %p104_p5 = scmp.ne.s32.totalorder %s885_s10, %s881_s9 }
   0x9   : > { %s1222_s19 = smov (%p25_p0, %s24_s19), 0  ;;  %s1224_s20 = smov (!%p25_p0, %s27_s20), %s905_s15 }
   0xa   : > { %s84_s21 = ssub.s32 %s901_s14, %s1222_s19  ;;  %p981_p3 = por %p99_p2, %p98_p1 }
   0xb   : > { %p29_p4 = scmp.ge.s32.totalorder %s1224_s20, 2  ;;  %p105_p6 = scmp.eq.s32.totalorder %s575_s18, 3 }
   0xc   : > { %p578_p7 = scmp.ge.s32.totalorder %s909_s16, 1  ;;  %p141_p9 = scmp.lt.s32.totalorder %s909_s16, 5 }
   0xd   : > { %s1226_s20 = smov (%p29_p4, %s1224_s20), 0  ;;  %p990_p8 = por %p105_p6, %p104_p5 }
   0xe   : > { %s83_s24 = ssub.s32 %s905_s15, %s1226_s20  ;;  %s88_s25 = sadd.s32 1, %s889_s11 }
   0xf   : > { %s85_s26 = sor.u32 %s84_s21, %s83_s24  ;;  %p142_p10 = pnand %p578_p7, %p141_p9 }
  0x10   : > { %p86_p11 = scmp.eq.s32.totalorder %s85_s26, 0  ;;  %s582_s28 = sshll.u32 (!%p142_p10), %s893_s12, 4 }
  0x11   : > { %145 = sbr.rel (%p142_p10) target bundleno = 312 (0x138), region = 28  ;;  %s580_s29 = sshll.u32 (!%p142_p10), %s897_s13, 4 }
  0x12   : > { %s999_s27 = scalar_select %p86_p11, %s889_s11, %s88_s25  }
  0x13   : > { %p175_p12 = scmp.lt.s32.totalorder (!%p142_p10), %s582_s28, 31  ;;  %p169_p13 = scmp.lt.s32.totalorder (!%p142_p10), %s580_s29, 31 }
  0x14   : > { %s165_s18 = sand.u32 (!%p142_p10), 1, %s885_s10   ;;  %s622_s25 = sshll.u32 (!%p142_p10), %s897_s13, 5 }
  0x15   : > { %s579_s21 = sshll.u32 (!%p142_p10), %s165_s18, 7  ;;  %s484_s26 = sadd.s32 (!%p142_p10), %s893_s12, %s622_s25 }
  0x16   : > { %s1228_s28 = smov (!%p175_p12, %s582_s28), 31  ;;  %s1230_s29 = smov (!%p169_p13, %s580_s29), 31  ;;  %vm213_vm0 = vcmask 261120  }
  0x17   : > { %s583_s30 = sshll.u32 %s1228_s28, 3  ;;  %s581_s6 = sshll.u32 %s1230_s29, 3 }
  0x18   : > { %s1006_s5 = scalar_lea.vmem %s1210_s1, %s583_s30  ;;  %s1017_s17 = scalar_lea.vmem %s1209_s0, %s581_s6 }
  0x19   : > { %v212_v0 = vld [vmem:[%s1006_s5 + $0x78] sm:$0xff]  ;;  %v211_v1 = vld [vmem:[%s1006_s5 + $0x70] sm:$0xff]  ;;  %v210_v2 = vld [vmem:[%s1006_s5 + $0x68] sm:$0xff]  ;;  %s1128_s24 = scalar_lea.vmem [#allocation2], %s579_s21  ;;  %s619_s13 = sshll.u32 %s484_s26, 7 }
  0x1a   : > { %655 = vmatprep.subr.msk.mxu0 %vm213_vm0, %v212_v0  ;;  %711 = vmatprep.subr.msk.mxu1 %vm213_vm0, %v212_v0  ;;  %v181_v3 = vld [vmem:[%s1017_s17] sm:$0xff]  ;;  %v208_v6 = vld [vmem:[%s1006_s5 + $0x58] sm:$0xff]  ;;  %v207_v7 = vld [vmem:[%s1006_s5 + $0x50] sm:$0xff]  ;;  %s487_s28 = sshll.u32 %s1128_s24, 4  ;;  %s1148_s30 = scalar_lea.hbm %s1211_s2, %s619_s13  ;;  %s1150_s28 = int_to_ptr.vmem [resolvable:$true] %s487_s28 }
  0x1b   : > { %656 = vmatpush3.xpose.msk.msra.mxu0 %vm213_vm0, %v212_v0  ;;  %727 = vmatpush3.xpose.msk.msra.mxu1 %vm213_vm0, %v212_v0  ;;  %v189_v4 = vld [vmem:[%s1017_s17 + $0x40] sm:$0xff]  ;;  %v206_v8 = vld [vmem:[%s1006_s5 + $0x48] sm:$0xff]  ;;  %v204_v10 = vld [vmem:[%s1006_s5 + $0x38] sm:$0xff]  ;;  %s1158_s3 = scalar_lea.sflag [#allocation3], %s165_s18  ;;  %s817_s4 = scalar_lea.vmem %s1150_s28, 2048 }
  0x1c   : > { %657 = vmatprep.subr.msk.mxu0 %vm213_vm0, %v211_v1  ;;  %712 = vmatprep.subr.msk.mxu1 %vm213_vm0, %v211_v1  ;;  %v209_v5 = vld [vmem:[%s1006_s5 + $0x60] sm:$0xff]  ;;  %v203_v11 = vld [vmem:[%s1006_s5 + $0x30] sm:$0xff]  ;;  %v202_v12 = vld [vmem:[%s1006_s5 + $0x28] sm:$0xff]  ;;  %p818_p0 = scmp.ne.s32.totalorder %s1150_s28, %s817_s4 }
  0x1d   : > { %687 = vmatprep.mubr.msk.f32.mxu0 %vm213_vm0, %v181_v3  ;;  %699 = vmatprep.mubr.msk.f32.mxu1 %vm213_vm0, %v189_v4  ;;  %v205_v9 = vld [vmem:[%s1006_s5 + $0x40] sm:$0xff]  ;;  %v200_v14 = vld [vmem:[%s1006_s5 + $0x18] sm:$0xff]  ;;  %v199_v15 = vld [vmem:[%s1006_s5 + $0x10] sm:$0xff] }
  0x1e   : > { %v201_v13 = vld [vmem:[%s1006_s5 + $0x20] sm:$0xff]  ;;  %v198_v16 = vld [vmem:[%s1006_s5 + $0x8] sm:$0xff]  ;;  %v183_v20 = vld [vmem:[%s1017_s17 + $0x10] sm:$0xff]  ;;  %p819_p1 = pnand %p818_p0, %p981_p3 }
  0x1f   : > { %658 = vmatpush3.xpose.msk.msra.mxu0 %vm213_vm0, %v211_v1  ;;  %728 = vmatpush3.xpose.msk.msra.mxu1 %vm213_vm0, %v211_v1  ;;  %v197_v17 = vld [vmem:[%s1006_s5] sm:$0xff]  ;;  %v182_v18 = vld [vmem:[%s1017_s17 + $0x8] sm:$0xff]  ;;  %v191_v21 = vld [vmem:[%s1017_s17 + $0x50] sm:$0xff]  ;;  %s911_s5 = smov [#allocation2]  }
  0x20   : > { %659 = vmatprep.subr.msk.mxu0 %vm213_vm0, %v210_v2  ;;  %713 = vmatprep.subr.msk.mxu1 %vm213_vm0, %v210_v2  ;;  %v190_v19 = vld [vmem:[%s1017_s17 + $0x48] sm:$0xff]  ;;  %v184_v22 = vld [vmem:[%s1017_s17 + $0x18] sm:$0xff]  ;;  %v185_v24 = vld [vmem:[%s1017_s17 + $0x20] sm:$0xff]  ;;  %p820_p2 = pneg %p819_p1  ;;  %s821_s6 = sshll.u32 %s911_s5, 4  ;;  %s822_s6 = int_to_ptr.vmem [resolvable:$false] %s821_s6 }
  0x21   : > { %v192_v23 = vld [vmem:[%s1017_s17 + $0x58] sm:$0xff]  ;;  %v193_v25 = vld [vmem:[%s1017_s17 + $0x60] sm:$0xff]  ;;  %v186_v26 = vld [vmem:[%s1017_s17 + $0x28] sm:$0xff]  ;;  %s823_s7 = scalar_lea.vmem %s822_s6, 4096  ;;  %p824_p4 = scmp.lt.s32.totalorder %s1150_s28, %s822_s6 }
  0x22   : > { %v194_v27 = vld [vmem:[%s1017_s17 + $0x68] sm:$0xff]  ;;  %v187_v28 = vld [vmem:[%s1017_s17 + $0x30] sm:$0xff]  ;;  %v188_v30 = vld [vmem:[%s1017_s17 + $0x38] sm:$0xff]  ;;  %p825_p5 = scmp.lt.s32.totalorder %s823_s7, %s817_s4 }
  0x23   : > { %660 = vmatpush3.xpose.msk.msra.mxu0 %vm213_vm0, %v210_v2  ;;  %729 = vmatpush3.xpose.msk.msra.mxu1 %vm213_vm0, %v210_v2  ;;  %v195_v29 = vld [vmem:[%s1017_s17 + $0x70] sm:$0xff]  ;;  %v196_v31 = vld [vmem:[%s1017_s17 + $0x78] sm:$0xff] }
  0x24   : > { %661 = vmatprep.subr.msk.mxu0 %vm213_vm0, %v209_v5  ;;  %714 = vmatprep.subr.msk.mxu1 %vm213_vm0, %v209_v5  ;;  %p826_p6 = por %p825_p5, %p824_p4 }
  0x26   : > { %p827_p7 = pnand %p826_p6, %p820_p2 }
  0x27   : > { %662 = vmatpush3.xpose.msk.msra.mxu0 %vm213_vm0, %v209_v5  ;;  %730 = vmatpush3.xpose.msk.msra.mxu1 %vm213_vm0, %v209_v5 }
  0x28   : > { %663 = vmatprep.subr.msk.mxu0 %vm213_vm0, %v208_v6  ;;  %715 = vmatprep.subr.msk.mxu1 %vm213_vm0, %v208_v6 }
  0x2b   : > { %664 = vmatpush3.xpose.msk.msra.mxu0 %vm213_vm0, %v208_v6  ;;  %731 = vmatpush3.xpose.msk.msra.mxu1 %vm213_vm0, %v208_v6 }
  0x2c   : > { %665 = vmatprep.subr.msk.mxu0 %vm213_vm0, %v207_v7  ;;  %716 = vmatprep.subr.msk.mxu1 %vm213_vm0, %v207_v7 }
  0x2f   : > { %666 = vmatpush3.xpose.msk.msra.mxu0 %vm213_vm0, %v207_v7  ;;  %732 = vmatpush3.xpose.msk.msra.mxu1 %vm213_vm0, %v207_v7 }
  0x30   : > { %667 = vmatprep.subr.msk.mxu0 %vm213_vm0, %v206_v8  ;;  %717 = vmatprep.subr.msk.mxu1 %vm213_vm0, %v206_v8 }
  0x33   : > { %668 = vmatpush3.xpose.msk.msra.mxu0 %vm213_vm0, %v206_v8  ;;  %733 = vmatpush3.xpose.msk.msra.mxu1 %vm213_vm0, %v206_v8 }
  0x34   : > { %669 = vmatprep.subr.msk.mxu0 %vm213_vm0, %v205_v9  ;;  %718 = vmatprep.subr.msk.mxu1 %vm213_vm0, %v205_v9 }
  0x37   : > { %670 = vmatpush3.xpose.msk.msra.mxu0 %vm213_vm0, %v205_v9  ;;  %734 = vmatpush3.xpose.msk.msra.mxu1 %vm213_vm0, %v205_v9 }
  0x38   : > { %671 = vmatprep.subr.msk.mxu0 %vm213_vm0, %v204_v10  ;;  %719 = vmatprep.subr.msk.mxu1 %vm213_vm0, %v204_v10 }
  0x3b   : > { %672 = vmatpush3.xpose.msk.msra.mxu0 %vm213_vm0, %v204_v10  ;;  %735 = vmatpush3.xpose.msk.msra.mxu1 %vm213_vm0, %v204_v10 }
  0x3c   : > { %673 = vmatprep.subr.msk.mxu0 %vm213_vm0, %v203_v11  ;;  %720 = vmatprep.subr.msk.mxu1 %vm213_vm0, %v203_v11 }
  0x3f   : > { %674 = vmatpush3.xpose.msk.msra.mxu0 %vm213_vm0, %v203_v11  ;;  %736 = vmatpush3.xpose.msk.msra.mxu1 %vm213_vm0, %v203_v11 }
  0x40   : > { %675 = vmatprep.subr.msk.mxu0 %vm213_vm0, %v202_v12  ;;  %721 = vmatprep.subr.msk.mxu1 %vm213_vm0, %v202_v12 }
  0x43   : > { %676 = vmatpush3.xpose.msk.msra.mxu0 %vm213_vm0, %v202_v12  ;;  %737 = vmatpush3.xpose.msk.msra.mxu1 %vm213_vm0, %v202_v12 }
  0x44   : > { %677 = vmatprep.subr.msk.mxu0 %vm213_vm0, %v201_v13  ;;  %722 = vmatprep.subr.msk.mxu1 %vm213_vm0, %v201_v13 }
  0x47   : > { %678 = vmatpush3.xpose.msk.msra.mxu0 %vm213_vm0, %v201_v13  ;;  %738 = vmatpush3.xpose.msk.msra.mxu1 %vm213_vm0, %v201_v13 }
  0x48   : > { %679 = vmatprep.subr.msk.mxu0 %vm213_vm0, %v200_v14  ;;  %723 = vmatprep.subr.msk.mxu1 %vm213_vm0, %v200_v14 }
  0x4b   : > { %680 = vmatpush3.xpose.msk.msra.mxu0 %vm213_vm0, %v200_v14  ;;  %739 = vmatpush3.xpose.msk.msra.mxu1 %vm213_vm0, %v200_v14 }
  0x4c   : > { %681 = vmatprep.subr.msk.mxu0 %vm213_vm0, %v199_v15  ;;  %724 = vmatprep.subr.msk.mxu1 %vm213_vm0, %v199_v15 }
  0x4f   : > { %682 = vmatpush3.xpose.msk.msra.mxu0 %vm213_vm0, %v199_v15  ;;  %740 = vmatpush3.xpose.msk.msra.mxu1 %vm213_vm0, %v199_v15 }
  0x50   : > { %683 = vmatprep.subr.msk.mxu0 %vm213_vm0, %v198_v16  ;;  %725 = vmatprep.subr.msk.mxu1 %vm213_vm0, %v198_v16 }
  0x53   : > { %684 = vmatpush3.xpose.msk.msra.mxu0 %vm213_vm0, %v198_v16  ;;  %741 = vmatpush3.xpose.msk.msra.mxu1 %vm213_vm0, %v198_v16 }
  0x54   : > { %685 = vmatprep.subr.msk.mxu0 %vm213_vm0, %v197_v17  ;;  %726 = vmatprep.subr.msk.mxu1 %vm213_vm0, %v197_v17 }
  0x57   : > { %686 = vmatpush3.xpose.msk.msra.mxu0 %vm213_vm0, %v197_v17  ;;  %742 = vmatpush3.xpose.msk.msra.mxu1 %vm213_vm0, %v197_v17 }
  0x5a   : > { %688 = vmatmul.mubr.msk.f32.vlgmr.msra.gmra.mxu0 %vm213_vm0, %v182_v18  ;;  %700 = vmatmul.mubr.msk.f32.vlgmr.msra.gmra.mxu1 %vm213_vm0, %v190_v19 }
  0x5b   : > { %690 = vmatprep.mubr.msk.f32.mxu0 %vm213_vm0, %v183_v20  ;;  %702 = vmatprep.mubr.msk.f32.mxu1 %vm213_vm0, %v191_v21 }
  0x5e   : > { %691 = vmatmul.mubr.msk.f32.gmra.mxu0 %vm213_vm0, %v184_v22  ;;  %703 = vmatmul.mubr.msk.f32.gmra.mxu1 %vm213_vm0, %v192_v23 }
  0x5f   : > { %693 = vmatprep.mubr.msk.f32.mxu0 %vm213_vm0, %v185_v24  ;;  %705 = vmatprep.mubr.msk.f32.mxu1 %vm213_vm0, %v193_v25 }
  0x62   : > { %694 = vmatmul.mubr.msk.f32.gmra.mxu0 %vm213_vm0, %v186_v26  ;;  %706 = vmatmul.mubr.msk.f32.gmra.mxu1 %vm213_vm0, %v194_v27 }
  0x63   : > { %696 = vmatprep.mubr.msk.f32.mxu0 %vm213_vm0, %v187_v28  ;;  %708 = vmatprep.mubr.msk.f32.mxu1 %vm213_vm0, %v195_v29 }
  0x66   : > { %697 = vmatmul.mubr.msk.f32.gmra.mxu0 %vm213_vm0, %v188_v30  ;;  %709 = vmatmul.mubr.msk.f32.gmra.mxu1 %vm213_vm0, %v196_v31 }
 0x11a   : > { %v689_v32 = vpop.f32.mrf.mxu0  ;;  %v701_v33 = vpop.f32.mrf.mxu1 }
 0x11b   : > { %456 = vst [vmem:[%s1128_s24 + $0x8] sm:$0xff] %v689_v32  ;;  %464 = vst [vmem:[%s1128_s24 + $0x48] sm:$0xff] %v701_v33 }
 0x11c   : > { %v376_v34 = vpop.f32.mrf.mxu0  ;;  %v416_v35 = vpop.f32.mrf.mxu1 }
 0x11d   : > { %455 = vst [vmem:[%s1128_s24] sm:$0xff] %v376_v34  ;;  %463 = vst [vmem:[%s1128_s24 + $0x40] sm:$0xff] %v416_v35 }
 0x11e   : > { %v692_v36 = vpop.f32.mrf.mxu0  ;;  %v704_v37 = vpop.f32.mrf.mxu1 }
 0x11f   : > { %458 = vst [vmem:[%s1128_s24 + $0x18] sm:$0xff] %v692_v36  ;;  %466 = vst [vmem:[%s1128_s24 + $0x58] sm:$0xff] %v704_v37 }
 0x120   : > { %v386_v38 = vpop.f32.mrf.mxu0  ;;  %v426_v39 = vpop.f32.mrf.mxu1 }
 0x121   : > { %457 = vst [vmem:[%s1128_s24 + $0x10] sm:$0xff] %v386_v38  ;;  %465 = vst [vmem:[%s1128_s24 + $0x50] sm:$0xff] %v426_v39 }
 0x122   : > { %v695_v40 = vpop.f32.mrf.mxu0  ;;  %v707_v41 = vpop.f32.mrf.mxu1 }
 0x123   : > { %460 = vst [vmem:[%s1128_s24 + $0x28] sm:$0xff] %v695_v40  ;;  %468 = vst [vmem:[%s1128_s24 + $0x68] sm:$0xff] %v707_v41 }
 0x124   : > { %v396_v42 = vpop.f32.mrf.mxu0  ;;  %v436_v43 = vpop.f32.mrf.mxu1 }
 0x125   : > { %459 = vst [vmem:[%s1128_s24 + $0x20] sm:$0xff] %v396_v42  ;;  %467 = vst [vmem:[%s1128_s24 + $0x60] sm:$0xff] %v436_v43 }
 0x126   : > { %v698_v44 = vpop.f32.mrf.mxu0  ;;  %v710_v45 = vpop.f32.mrf.mxu1 }
 0x127   : > { %462 = vst [vmem:[%s1128_s24 + $0x38] sm:$0xff] %v698_v44  ;;  %470 = vst [vmem:[%s1128_s24 + $0x78] sm:$0xff] %v710_v45 }
 0x128   : > { %v406_v46 = vpop.f32.mrf.mxu0  ;;  %v446_v47 = vpop.f32.mrf.mxu1 }
 0x129   : > { %461 = vst [vmem:[%s1128_s24 + $0x30] sm:$0xff] %v406_v46  ;;  %469 = vst [vmem:[%s1128_s24 + $0x70] sm:$0xff] %v446_v47 }
 0x12a   : > { %830 = shalt.err (!%p827_p7)
}
 0x12b   : > { %s831_s8 = scalar_lea.hbm %s1148_s30, 2048  ;;  %s835_s21 = scalar_lea.hbm %s1211_s2, 8192 }
 0x12c   : > { %p832_p9 = scmp.ne.s32.totalorder %s1148_s30, %s831_s8  ;;  %p836_p12 = scmp.lt.s32.totalorder %s1148_s30, %s1211_s2 }
 0x12d   : > { %p837_p13 = scmp.lt.s32.totalorder %s835_s21, %s831_s8 }
 0x12e   : > { %p833_p10 = pnand %p832_p9, %p981_p3 }
 0x12f   : > { %p838_p0 = por %p837_p13, %p836_p12 }
 0x130   : > { %p834_p11 = pneg %p833_p10 }
 0x132   : > { %p839_p1 = pnand %p838_p0, %p834_p11 }
 0x134   : > { %842 = shalt.err (!%p839_p1)
}
 0x135   : > { %s912_s26 = smov 128   ;;  %s913_s13 = smov 256  }
 0x136   : > { %s914_s12 = smov 8  }
 0x137   : > { %743 = dma.vmem_to_hbm [thread:$0]  (%p981_p3), %s1150_s28, 2048, %s1148_s30, %s1158_s3, %s912_s26, %s913_s13, %s914_s12  }
 0x138 PF: > { %p749_p2 = scmp.ge.s32.totalorder %s909_s16, 2  ;;  %s502_s29 = sand.u32 1, %s881_s9  }
 0x139   : > { %s503_s4 = scalar_lea.sflag [#allocation3], %s502_s29 }
 0x13a   : > { %p746_p4 = pnand %p749_p2, %p990_p8 }
 0x13c   : > { %p747_p5 = pneg %p746_p4 }
 0x13e   : > { %876 = dma.done.wait (%p747_p5), %s503_s4, 2048  }
 0x13f   : > { %878 = vsyncadd (%p747_p5), %s503_s4, 4294965248  ;;  %s15_s16 = sadd.s32 1, %s909_s16   ;;  %s1214_s9 = smov %s885_s10 }
 0x140   : > { %p12_p6 = scmp.ge.s32.totalorder %s15_s16, 6   ;;  %s1215_s10 = smov %s889_s11 }
 0x141   : > { %s1216_s11 = smov %s999_s27  ;;  %s1217_s12 = smov %s901_s14 }
 0x142   : > { %s1218_s13 = smov %s905_s15  ;;  %s1219_s14 = smov %s1222_s19 }
 0x143   : > { %s1220_s15 = smov %s1226_s20  ;;  %14 = sbr.rel (!%p12_p6) target bundleno = 5 (0x5), region = 66 }
 0x148   :  { %508 = vsyncpa [#allocation3], 1 }
 0x149   :  { %510 = vsyncpa [#allocation3 + $0x1], 1 }

</bundles_post_ra>
